<compile_context>
chip_gen: v5e
topology: v5e:2x2
jax: 0.10.0
libtpu: 0.0.40
codegen_flags: <defaults>
</compile_context>

<pallas_src>
import math
import functools

import jax
import jax.numpy as jnp
from jax import lax
from jax.experimental import pallas as pl
from jax.experimental.pallas import tpu as pltpu


def _attention_body(q_ref, k_ref, v_ref, mask_ref, out_ref, probs_ref, inv_scale):
    # q_ref:    (G, TQ, D)
    # k_ref:    (G, Sk, D)
    # v_ref:    (G, Sk, D)
    # mask_ref: (G, TQ, Sk) (1 = keep, 0 = mask out) or None
    # out_ref:  (G, TQ, D)
    # probs_ref:(G, TQ, Sk)
    q = q_ref[...]
    k = k_ref[...]
    v = v_ref[...]

    if q.dtype == jnp.float32:
        # Exact f32 fold of 1/sqrt(key_size) into Q: O(TQ*D) multiplies instead of
        # O(TQ*Sk) on the score matrix.
        q = q * jnp.float32(inv_scale)
        post_scale = None
    else:
        # Low-precision inputs: scale the f32 scores (reference semantics) to avoid
        # an extra rounding step on Q before the MXU.
        post_scale = jnp.float32(inv_scale)

    # scores[g, q, k] = sum_d Q[g, q, d] * K[g, k, d]  (no explicit K^T / XLU transpose)
    scores = lax.dot_general(
        q, k,
        dimension_numbers=(((2,), (2,)), ((0,), (0,))),
        preferred_element_type=jnp.float32,
    )
    if post_scale is not None:
        scores = scores * post_scale

    if mask_ref is not None:
        scores = jnp.where(mask_ref[...] == 0, jnp.float32(-1.0e9), scores)

    # Numerically stable softmax over the key axis (f32 math).
    m = jnp.max(scores, axis=-1, keepdims=True)
    e = jnp.exp(scores - m)
    denom = jnp.sum(e, axis=-1, keepdims=True)
    # Exact reciprocal: approx=True (EUP vrcp) relative error can exceed the 1e-5
    # accuracy target for probs.
    probs = e * pl.reciprocal(denom, approx=False)

    # Single f32 -> low-precision cast, reused for the second matmul and the probs
    # store (removes one full-tile VPU packing pass).
    p_lo = probs.astype(v.dtype)
    out = lax.dot_general(
        p_lo, v,
        dimension_numbers=(((2,), (1,)), ((0,), (0,))),
        preferred_element_type=jnp.float32,
    )
    out_ref[...] = out.astype(out_ref.dtype)
    if probs_ref.dtype == p_lo.dtype:
        probs_ref[...] = p_lo
    else:
        probs_ref[...] = probs.astype(probs_ref.dtype)


def _attention_kernel_masked(q_ref, k_ref, v_ref, mask_ref, out_ref, probs_ref, *, inv_scale):
    _attention_body(q_ref, k_ref, v_ref, mask_ref, out_ref, probs_ref, inv_scale)


def _attention_kernel_nomask(q_ref, k_ref, v_ref, out_ref, probs_ref, *, inv_scale):
    _attention_body(q_ref, k_ref, v_ref, None, out_ref, probs_ref, inv_scale)


def _vmem_capacity_bytes():
    try:
        return int(pltpu.get_tpu_info().vmem_capacity_bytes)
    except Exception:
        return 128 * 1024 * 1024  # conservative default (v5e/v6e); v7x has 64 MiB


def _choose_q_tile(Sq, Sk, step_bytes_fn, budget_bytes):
    # Small sequences: take Sq whole and let the head-group axis absorb all
    # batching (grid-overhead-dominated regime; one fewer grid dimension).
    if Sq <= 256:
        return Sq
    candidates = [512, 256, 128, 64, 32]
    if Sk >= 2048:
        # Large Sk: the f32 scores/exp temporaries scale as TQ*Sk; TQ=512 buys no
        # MXU-shape benefit on v5e and doubles spill/VMEM pressure on all gens.
        candidates = [256, 128, 64, 32]
    divisors = [c for c in candidates if Sq % c == 0]
    if not divisors:
        return Sq
    for c in divisors:
        if step_bytes_fn(1, c) <= budget_bytes:
            return c
    return divisors[-1]  # smallest divisor; chooser will keep G=1 (best effort)


def _choose_head_group(BH, n_q_tiles, step_bytes_fn, budget_bytes):
    best = 1
    for g in range(1, BH + 1):
        if BH % g == 0 and step_bytes_fn(g) <= budget_bytes:
            best = g
    # Keep at least 2 grid steps so v7x's two TensorCores can both get work.
    if BH >= 2 and (BH // best) * n_q_tiles < 2:
        for g in range(best, 0, -1):
            if BH % g == 0 and BH // g >= 2:
                best = g
                break
    return best


def attention(Q, K, V, mask=None, *, key_size=None):
    """Pallas TPU implementation of the PyTorch Attention.forward.

    Q: [B, H, Sq, D], K/V: [B, H, Sk, D], mask: [B, H, Sq, Sk] (1=keep) or None.
    Returns (output [B, H, Sq, D], probs [B, H, Sq, Sk]) in Q's dtype.
    """
    B, H, Sq, D = Q.shape
    Sk = K.shape[-2]
    if key_size is None:
        key_size = D
    inv_scale = 1.0 / math.sqrt(float(key_size))

    BH = B * H
    q = Q.reshape(BH, Sq, D)
    k = K.reshape(BH, Sk, D)
    v = V.reshape(BH, Sk, D)
    has_mask = mask is not None
    mask_r = mask.reshape(BH, Sq, Sk) if has_mask else None

    out_dtype = Q.dtype
    # TODO(synk): returning probs in bf16 for f32 inputs would halve the dominant
    # HBM writeback but changes the public dtype contract; needs API sign-off.
    probs_dtype = Q.dtype

    in_bytes = jnp.dtype(Q.dtype).itemsize
    out_bytes = jnp.dtype(out_dtype).itemsize
    probs_bytes = jnp.dtype(probs_dtype).itemsize
    mask_bytes = jnp.dtype(mask_r.dtype).itemsize if has_mask else 0

    # Generation-aware VMEM budgets (v5e/v6e: 128 MiB, v7x: 64 MiB).
    vmem_cap = _vmem_capacity_bytes()
    budget_bytes = int(0.35 * vmem_cap)       # per-step tile budget
    vmem_limit_bytes = int(0.75 * vmem_cap)   # scoped limit with compiler headroom

    def step_bytes(g, tq, kv_buffers=2):
        # BlockSpec-managed tiles (double-buffered unless overridden).
        qb = 2 * g * tq * D * in_bytes
        kvb = kv_buffers * 2 * g * Sk * D * in_bytes
        ob = 2 * g * tq * D * out_bytes
        pb = 2 * g * tq * Sk * probs_bytes
        mb = 2 * g * tq * Sk * mask_bytes
        # Three simultaneously-live f32 (g, tq, Sk) softmax temporaries
        # (scores, exp, probs) plus the low-precision probs copy.
        tmp = 3 * g * tq * Sk * 4 + g * tq * Sk * probs_bytes
        return qb + kvb + ob + pb + mb + tmp

    TQ = _choose_q_tile(Sq, Sk, lambda g, tq: step_bytes(g, tq), budget_bytes)
    n_q_tiles = Sq // TQ
    G = _choose_head_group(BH, n_q_tiles, lambda g: step_bytes(g, TQ), budget_bytes)

    # K/V block indices only change on the head axis; if we are still over budget
    # (large Sk) and there are multiple q-tiles, single-buffer K/V to reclaim VMEM.
    kv_single_buffer = n_q_tiles > 1 and step_bytes(G, TQ, kv_buffers=2) > budget_bytes

    if n_q_tiles == 1:
        grid = (BH // G,)
        q_idx = lambda g: (g, 0, 0)
        kv_idx = lambda g: (g, 0, 0)
        dim_sem = ("parallel",)
    else:
        grid = (BH // G, n_q_tiles)
        q_idx = lambda g, t: (g, t, 0)
        kv_idx = lambda g, t: (g, 0, 0)
        # v7x megacore: bias the core split to the head axis so K/V blocks are
        # fetched once per head group per core, not duplicated across cores.
        dim_sem = ("parallel", "arbitrary") if BH // G >= 2 else ("parallel", "parallel")

    kv_kwargs = {"pipeline_mode": pl.Buffered(1)} if kv_single_buffer else {}
    in_specs = [
        pl.BlockSpec((G, TQ, D), q_idx),                 # Q
        pl.BlockSpec((G, Sk, D), kv_idx, **kv_kwargs),   # K (whole Sk per step)
        pl.BlockSpec((G, Sk, D), kv_idx, **kv_kwargs),   # V
    ]
    args = [q, k, v]
    if has_mask:
        # Mask travels in the caller's dtype (no wrapper astype -> no extra HBM pass).
        in_specs.append(pl.BlockSpec((G, TQ, Sk), q_idx))
        args.append(mask_r)
        kernel = functools.partial(_attention_kernel_masked, inv_scale=inv_scale)
    else:
        kernel = functools.partial(_attention_kernel_nomask, inv_scale=inv_scale)

    out_specs = [
        pl.BlockSpec((G, TQ, D), q_idx),
        pl.BlockSpec((G, TQ, Sk), q_idx),
    ]

    out, probs = pl.pallas_call(
        kernel,
        out_shape=(
            jax.ShapeDtypeStruct((BH, Sq, D), out_dtype),
            jax.ShapeDtypeStruct((BH, Sq, Sk), probs_dtype),
        ),
        grid_spec=pltpu.PrefetchScalarGridSpec(
            num_scalar_prefetch=0,
            grid=grid,
            in_specs=in_specs,
            out_specs=out_specs,
        ),
        compiler_params=pltpu.CompilerParams(
            dimension_semantics=dim_sem,
            vmem_limit_bytes=vmem_limit_bytes,
        ),
    )(*args)

    return out.reshape(B, H, Sq, D), probs.reshape(B, H, Sq, Sk)


def _reference_attention(Q, K, V, mask, key_size):
    scaling = float(key_size) ** 0.5
    scores = jnp.einsum("bhqd,bhkd->bhqk", Q, K) / scaling
    if mask is not None:
        scores = jnp.where(mask == 0, -1.0e9, scores)
    probs = jax.nn.softmax(scores, axis=-1)
    out = jnp.einsum("bhqk,bhkd->bhqd", probs, V)
    return out, probs


if __name__ == "__main__":
    key = jax.random.PRNGKey(0)
    kq, kk, kv, km = jax.random.split(key, 4)

    B, H, Sq, Sk, D = 2, 2, 8, 8, 32  # key_size = D = 32

    Q = jax.random.normal(kq, (B, H, Sq, D), dtype=jnp.float32)
    K = jax.random.normal(kk, (B, H, Sk, D), dtype=jnp.float32)
    V = jax.random.normal(kv, (B, H, Sk, D), dtype=jnp.float32)
    # deterministic 0/1 mask (1 = keep), with at least one keep per row
    mask = (jax.random.uniform(km, (B, H, Sq, Sk)) > 0.3).astype(jnp.int32)
    mask = mask.at[..., 0].set(1)

    # Masked path
    out, probs = attention(Q, K, V, mask, key_size=D)
    out = jax.block_until_ready(out)
    probs = jax.block_until_ready(probs)
    ref_out, ref_probs = _reference_attention(Q, K, V, mask, key_size=D)
    assert out.shape == (B, H, Sq, D)
    assert probs.shape == (B, H, Sq, Sk)
    assert jnp.allclose(out, ref_out, atol=1e-5, rtol=1e-5)
    assert jnp.allclose(probs, ref_probs, atol=1e-5, rtol=1e-5)

    # mask=None path (mask input + masking elided at trace time)
    out_nm, probs_nm = attention(Q, K, V, None, key_size=D)
    out_nm = jax.block_until_ready(out_nm)
    probs_nm = jax.block_until_ready(probs_nm)
    ref_out_nm, ref_probs_nm = _reference_attention(Q, K, V, None, key_size=D)
    assert jnp.allclose(out_nm, ref_out_nm, atol=1e-5, rtol=1e-5)
    assert jnp.allclose(probs_nm, ref_probs_nm, atol=1e-5, rtol=1e-5)

    print("KERNEL_OK")
</pallas_src>

<mosaic_0001>
module attributes {stable_mosaic.version = 11 : i64} {
  func.func @_attention_kernel_masked(%arg0: i32, %arg1: memref<2x8x32xf32, #tpu.memory_space<vmem>>, %arg2: memref<2x8x32xf32, #tpu.memory_space<vmem>>, %arg3: memref<2x8x32xf32, #tpu.memory_space<vmem>>, %arg4: memref<2x8x8xi32, #tpu.memory_space<vmem>>, %arg5: memref<2x8x32xf32, #tpu.memory_space<vmem>>, %arg6: memref<2x8x8xf32, #tpu.memory_space<vmem>>) attributes {dimension_semantics = [#tpu.dimension_semantics<parallel>], iteration_bounds = array<i64: 2>, scalar_prefetch = 0 : i64, scratch_operands = 0 : i64, tpu.core_type = #tpu.core_type<tc>, window_params = [{transform_indices = @transform_0, window_bounds = array<i64: 2, 8, 32>}, {transform_indices = @transform_1, window_bounds = array<i64: 2, 8, 32>}, {transform_indices = @transform_2, window_bounds = array<i64: 2, 8, 32>}, {transform_indices = @transform_3, window_bounds = array<i64: 2, 8, 8>}, {transform_indices = @transform_4, window_bounds = array<i64: 2, 8, 32>}, {transform_indices = @transform_5, window_bounds = array<i64: 2, 8, 8>}]} {
    %c0 = arith.constant 0 : index
    %c0_0 = arith.constant 0 : index
    %c0_1 = arith.constant 0 : index
    %0 = vector.load %arg1[%c0, %c0_0, %c0_1] : memref<2x8x32xf32, #tpu.memory_space<vmem>>, vector<2x8x32xf32>
    %c0_2 = arith.constant 0 : index
    %c0_3 = arith.constant 0 : index
    %c0_4 = arith.constant 0 : index
    %1 = vector.load %arg2[%c0_2, %c0_3, %c0_4] : memref<2x8x32xf32, #tpu.memory_space<vmem>>, vector<2x8x32xf32>
    %c0_5 = arith.constant 0 : index
    %c0_6 = arith.constant 0 : index
    %c0_7 = arith.constant 0 : index
    %2 = vector.load %arg3[%c0_5, %c0_6, %c0_7] : memref<2x8x32xf32, #tpu.memory_space<vmem>>, vector<2x8x32xf32>
    %cst = arith.constant 0.176776692 : f32
    %3 = vector.broadcast %cst : f32 to vector<2x8x32xf32>
    %4 = arith.mulf %0, %3 : vector<2x8x32xf32>
    %cst_8 = arith.constant dense<0.000000e+00> : vector<2x8x8xf32>
    %5 = tpu.matmul %4, %1, %cst_8 {dimension_numbers = #tpu.dot_dimension_numbers<[2], [2], [1], [1], [0, 0, 0, 1, 1, 1], [0], [0]>} : vector<2x8x32xf32>, vector<2x8x32xf32>, vector<2x8x8xf32> -> vector<2x8x8xf32>
    %c0_9 = arith.constant 0 : index
    %c0_10 = arith.constant 0 : index
    %c0_11 = arith.constant 0 : index
    %6 = vector.load %arg4[%c0_9, %c0_10, %c0_11] : memref<2x8x8xi32, #tpu.memory_space<vmem>>, vector<2x8x8xi32>
    %c0_i32 = arith.constant 0 : i32
    %7 = vector.broadcast %c0_i32 : i32 to vector<2x8x8xi32>
    %8 = arith.cmpi eq, %6, %7 : vector<2x8x8xi32>
    %cst_12 = arith.constant -1.000000e+09 : f32
    %9 = vector.broadcast %cst_12 : f32 to vector<2x8x8xf32>
    %10 = arith.select %8, %9, %5 : vector<2x8x8xi1>, vector<2x8x8xf32>
    %cst_13 = arith.constant dense<0xFF800000> : vector<2x8xf32>
    %11 = vector.multi_reduction <maximumf>, %10, %cst_13 [2] : vector<2x8x8xf32> to vector<2x8xf32>
    %12 = vector.shape_cast %11 : vector<2x8xf32> to vector<2x8x1xf32>
    %13 = vector.broadcast %12 : vector<2x8x1xf32> to vector<2x8x8xf32>
    %14 = arith.subf %10, %13 : vector<2x8x8xf32>
    %15 = math.exp %14 : vector<2x8x8xf32>
    %cst_14 = arith.constant dense<0.000000e+00> : vector<2x8xf32>
    %16 = vector.multi_reduction <add>, %15, %cst_14 [2] : vector<2x8x8xf32> to vector<2x8xf32>
    %17 = vector.shape_cast %16 : vector<2x8xf32> to vector<2x8x1xf32>
    %18 = tpu.reciprocal %17 : vector<2x8x1xf32> -> vector<2x8x1xf32>
    %19 = vector.broadcast %18 : vector<2x8x1xf32> to vector<2x8x8xf32>
    %20 = arith.mulf %15, %19 : vector<2x8x8xf32>
    %cst_15 = arith.constant dense<0.000000e+00> : vector<2x8x32xf32>
    %21 = tpu.matmul %20, %2, %cst_15 {dimension_numbers = #tpu.dot_dimension_numbers<[2], [1], [1], [2], [0, 0, 0, 1, 1, 2], [0], [0]>} : vector<2x8x8xf32>, vector<2x8x32xf32>, vector<2x8x32xf32> -> vector<2x8x32xf32>
    %c0_16 = arith.constant 0 : index
    %c0_17 = arith.constant 0 : index
    %c0_18 = arith.constant 0 : index
    %22 = vector.load %arg5[%c0_16, %c0_17, %c0_18] : memref<2x8x32xf32, #tpu.memory_space<vmem>>, vector<2x8x32xf32>
    tpu.vector_store %arg5[%c0_16, %c0_17, %c0_18], %21 {strides = array<i32>} : memref<2x8x32xf32, #tpu.memory_space<vmem>>, vector<2x8x32xf32>,
    %c0_19 = arith.constant 0 : index
    %c0_20 = arith.constant 0 : index
    %c0_21 = arith.constant 0 : index
    %23 = vector.load %arg6[%c0_19, %c0_20, %c0_21] : memref<2x8x8xf32, #tpu.memory_space<vmem>>, vector<2x8x8xf32>
    tpu.vector_store %arg6[%c0_19, %c0_20, %c0_21], %20 {strides = array<i32>} : memref<2x8x8xf32, #tpu.memory_space<vmem>>, vector<2x8x8xf32>,
    return
  }
  func.func @transform_0(%arg0: i32) -> (i32, i32, i32) {
    %c0_i32 = arith.constant 0 : i32
    %c0_i32_0 = arith.constant 0 : i32
    %c0_i32_1 = arith.constant 0 : i32
    return %arg0, %c0_i32, %c0_i32_0 : i32, i32, i32
  }
  func.func @transform_1(%arg0: i32) -> (i32, i32, i32) {
    %c0_i32 = arith.constant 0 : i32
    %c0_i32_0 = arith.constant 0 : i32
    %c0_i32_1 = arith.constant 0 : i32
    return %arg0, %c0_i32, %c0_i32_0 : i32, i32, i32
  }
  func.func @transform_2(%arg0: i32) -> (i32, i32, i32) {
    %c0_i32 = arith.constant 0 : i32
    %c0_i32_0 = arith.constant 0 : i32
    %c0_i32_1 = arith.constant 0 : i32
    return %arg0, %c0_i32, %c0_i32_0 : i32, i32, i32
  }
  func.func @transform_3(%arg0: i32) -> (i32, i32, i32) {
    %c0_i32 = arith.constant 0 : i32
    %c0_i32_0 = arith.constant 0 : i32
    %c0_i32_1 = arith.constant 0 : i32
    return %arg0, %c0_i32, %c0_i32_0 : i32, i32, i32
  }
  func.func @transform_4(%arg0: i32) -> (i32, i32, i32) {
    %c0_i32 = arith.constant 0 : i32
    %c0_i32_0 = arith.constant 0 : i32
    %c0_i32_1 = arith.constant 0 : i32
    return %arg0, %c0_i32, %c0_i32_0 : i32, i32, i32
  }
  func.func @transform_5(%arg0: i32) -> (i32, i32, i32) {
    %c0_i32 = arith.constant 0 : i32
    %c0_i32_0 = arith.constant 0 : i32
    %c0_i32_1 = arith.constant 0 : i32
    return %arg0, %c0_i32, %c0_i32_0 : i32, i32, i32
  }
}

</mosaic_0001>

<bundles_post_ra>
// kernel: tpu_custom_call.1
= control target key start
LH: loop header
LB: loop body
LE: loop exit
PB: predicated region body
PF: predicated region fallthrough
CT: control target
= control target key end

     0   :  { %s1403_s0 = inlined_call_operand.hbm [shape: f32[4,8,32], index: 0, kind: input, shape index: {}]   ;;  %s1404_s1 = inlined_call_operand.hbm [shape: f32[4,8,32], index: 1, kind: input, shape index: {}]   ;;  %s1405_s2 = inlined_call_operand.hbm [shape: f32[4,8,32], index: 2, kind: input, shape index: {}]   ;;  %s1406_s3 = inlined_call_operand.hbm [shape: s32[4,8,8], index: 3, kind: input, shape index: {}]   ;;  %s1407_s4 = inlined_call_operand.hbm [shape: f32[4,8,32], index: 4, kind: output, shape index: {0}]   ;;  %s1408_s5 = inlined_call_operand.hbm [shape: f32[4,8,8], index: 5, kind: output, shape index: {1}]  }
   0x1   :  { %1415 = sst [smem:[#allocation22_spill]] %s1403_s0 }
   0x2   :  { %1416 = sst [smem:[#allocation23_spill]] %s1404_s1 }
   0x3   :  { %11 = vsyncpa [#allocation3], 0 }
   0x4   :  { %13 = vsyncpa [#allocation3 + $0x1], 0 }
   0x5   :  { %14 = vsyncpa [#allocation6], 0 }
   0x6   :  { %16 = vsyncpa [#allocation6 + $0x1], 0 }
   0x7   :  { %17 = vsyncpa [#allocation9], 0 }
   0x8   :  { %19 = vsyncpa [#allocation9 + $0x1], 0 }
   0x9   :  { %20 = vsyncpa [#allocation4], 0 }
   0xa   :  { %22 = vsyncpa [#allocation4 + $0x1], 0 }
   0xb   :  { %23 = vsyncpa [#allocation12], 0 }
   0xc   :  { %25 = vsyncpa [#allocation12 + $0x1], 0  ;;  %s1143_s18 = smov 0   ;;  %s1145_s19 = smov 0  }
   0xd   :  { %s1147_s20 = smov 0   ;;  %s1149_s21 = smov 0  }
   0xe LB: > { %1417 = sst [smem:[#allocation18_spill]] %s1103_s20  ;;  %s1164_s22 = sadd.s32 4294967295, %s1107_s21   ;;  %s1107_s21 = sphi %s1149_s21, %s1430_s21   ;;  %s1103_s20 = sphi %s1147_s20, %s1432_s20   ;;  %s1099_s19 = sphi %s1145_s19, %s1434_s19   ;;  %s1095_s18 = sphi %s1143_s18, %s1433_s18  }
   0xf   : > { %1418 = sst [smem:[#allocation19_spill]] %s1107_s21  ;;  %s761_s23 = sadd.s32 4294967294, %s1107_s21  }
  0x10   : > { %s1168_s24 = sadd.s32 1, %s1107_s21   ;;  %s38_s25 = sadd.s32 1, %s1103_s20 }
  0x11   : > { %1419 = sst [smem:[#allocation20_spill]] %s1168_s24  ;;  %s35_s26 = ssub.s32 %s1107_s21, %s1168_s24 }
  0x12   : > { %p45_p0 = scmp.ne.s32.totalorder %s1103_s20, %s1099_s19  ;;  %p36_p1 = scmp.eq.s32.totalorder %s35_s26, 0 }
  0x13   : > { %p46_p2 = scmp.eq.s32.totalorder %s1107_s21, 0  ;;  %p51_p3 = scmp.ne.s32.totalorder %s1099_s19, %s1095_s18 }
  0x14   : > { %p52_p4 = scmp.eq.s32.totalorder %s1164_s22, 0  ;;  %p153_p7 = scmp.eq.s32.totalorder %s1164_s22, 1 }
  0x15   : > { %s1180_s27 = scalar_select %p36_p1, %s1103_s20, %s38_s25  }
  0x16   : > { %p47_p5 = por %p46_p2, %p45_p0  ;;  %p1182_p6 = por %p52_p4, %p51_p3 }
  0x17   : > { %1420 = sst [smem:[#allocation21_spill]] %s1180_s27  ;;  %p159_p8 = scmp.eq.s32.totalorder %s761_s23, 1 }
  0x18   : > { %p763_p9 = scmp.ge.s32.totalorder %s1107_s21, 2  ;;  %p835_p10 = scmp.lt.s32.totalorder %s1107_s21, 2 }
  0x19   : > { %p1189_p11 = por %p153_p7, %p45_p0  ;;  %p1193_p12 = por %p159_p8, %p51_p3 }
  0x1a   : > { %s1198_s6 = sand.u32 1, %s1103_s20   ;;  %s1201_s7 = sshll.u32 %s1107_s21, 4 }
  0x1b   : > { %s1204_s8 = sshll.u32 %s1198_s6, 4  ;;  %p1206_p13 = pnand %p835_p10, %p47_p5 }
  0x1c   : > { %s227_s10 = sand.u32 1, %s1107_s21   ;;  %s1425_s1 = sld [smem:[#allocation23_spill]] }
  0x1d   : > { %s231_s14 = scalar_lea.vmem [#allocation5], %s1204_s8  ;;  %p776_p0 = scmp.ge.s32.totalorder %s1107_s21, 1 }
  0x1e   : > { %s239_s15 = sshll.u32 %s231_s14, 4  ;;  %s1217_s17 = scalar_lea.sflag [#allocation6], %s227_s10  ;;  %s240_s15 = int_to_ptr.vmem [resolvable:$true] %s239_s15 }
  0x1f   : > { %p885_p2 = pneg %p1206_p13 }
  0x22   : > { %s236_s13 = scalar_lea.hbm %s1425_s1, %s1201_s7  ;;  %s888_s12 = scalar_lea.hbm %s1425_s1, 32 }
  0x23   : > { %s237_s16 = sshll.u32 %s236_s13, 4  ;;  %s238_s16 = int_to_ptr.hbm [resolvable:$true] %s237_s16 }
  0x24   : > { %s881_s23 = sshra.s32 %s238_s16, 4  ;;  %s882_s23 = int_to_ptr.hbm [resolvable:$true] %s881_s23 }
  0x25   : > { %s883_s25 = scalar_lea.hbm %s882_s23, 16  ;;  %p889_p5 = scmp.lt.s32.totalorder %s882_s23, %s1425_s1 }
  0x26   : > { %p884_p1 = scmp.ne.s32.totalorder %s882_s23, %s883_s25  ;;  %p890_p7 = scmp.lt.s32.totalorder %s888_s12, %s883_s25 }
  0x28   : > { %p886_p3 = pnand %p885_p2, %p884_p1  ;;  %p891_p8 = por %p890_p7, %p889_p5 }
  0x2a   : > { %p887_p4 = pneg %p886_p3 }
  0x2c   : > { %p892_p10 = pnand %p891_p8, %p887_p4 }
  0x2e   : > { %895 = shalt.err (!%p892_p10)
}
  0x2f   : > { %s1412_s10 = smov 128   ;;  %s1110_s27 = smov 8  }
  0x30   : > { %821 = dma.hbm_to_vmem [thread:$0]  (!%p1206_p13), %s238_s16, 256, %s240_s15, %s1217_s17, %s1412_s10, %s1412_s10, %s1110_s27  }
  0x31   : > { %p291_p1 = scmp.lt.s32.totalorder %s1107_s21, 3  ;;  %s1426_s0 = sld [smem:[#allocation22_spill]] }
  0x32   : > { %s209_s13 = scalar_lea.vmem [#allocation2], %s1204_s8  ;;  %s206_s1 = scalar_lea.sflag [#allocation3], %s1198_s6 }
  0x33   : > { %p1243_p3 = pnand %p776_p0, %p291_p1  ;;  %s217_s14 = sshll.u32 %s209_s13, 4  ;;  %s218_s14 = int_to_ptr.vmem [resolvable:$true] %s217_s14 }
  0x37   : > { %s214_s26 = scalar_lea.hbm %s1426_s0, %s1201_s7  ;;  %s918_s23 = scalar_lea.hbm %s1426_s0, 32 }
  0x38   : > { %s215_s12 = sshll.u32 %s214_s26, 4  ;;  %s216_s12 = int_to_ptr.hbm [resolvable:$true] %s215_s12 }
  0x39   : > { %s911_s20 = sshra.s32 %s216_s12, 4  ;;  %s912_s20 = int_to_ptr.hbm [resolvable:$true] %s911_s20 }
  0x3a   : > { %s913_s24 = scalar_lea.hbm %s912_s20, 16  ;;  %p919_p0 = scmp.lt.s32.totalorder %s912_s20, %s1426_s0 }
  0x3b   : > { %p914_p4 = scmp.ne.s32.totalorder %s912_s20, %s913_s24  ;;  %p920_p8 = scmp.lt.s32.totalorder %s918_s23, %s913_s24 }
  0x3d   : > { %p916_p5 = pnand %p914_p4, %p885_p2  ;;  %p921_p10 = por %p920_p8, %p919_p0 }
  0x3f   : > { %p917_p7 = pneg %p916_p5 }
  0x41   : > { %p922_p1 = pnand %p921_p10, %p917_p7 }
  0x43   : > { %925 = shalt.err (!%p922_p1)
}
  0x44   : > { %s1428_s26 = smov 128   ;;  %s258_s16 = scalar_lea.hbm %s1405_s2, %s1201_s7 }
  0x45   : > { %818 = dma.hbm_to_vmem [thread:$0]  (!%p1206_p13), %s216_s12, 256, %s218_s14, %s206_s1, %s1428_s26, %s1428_s26, %s1110_s27  }
  0x46   : > { %s253_s21 = scalar_lea.vmem [#allocation7], %s1204_s8  ;;  %s259_s20 = sshll.u32 %s258_s16, 4  ;;  %s260_s20 = int_to_ptr.hbm [resolvable:$true] %s259_s20 }
  0x47   : > { %s261_s10 = sshll.u32 %s253_s21, 4  ;;  %s941_s24 = sshra.s32 %s260_s20, 4  ;;  %s262_s10 = int_to_ptr.vmem [resolvable:$true] %s261_s10  ;;  %s942_s24 = int_to_ptr.hbm [resolvable:$true] %s941_s24 }
  0x48   : > { %s943_s23 = scalar_lea.hbm %s942_s24, 16  ;;  %s948_s1 = scalar_lea.hbm %s1405_s2, 32 }
  0x49   : > { %p944_p4 = scmp.ne.s32.totalorder %s942_s24, %s943_s23  ;;  %p949_p0 = scmp.lt.s32.totalorder %s942_s24, %s1405_s2 }
  0x4a   : > { %p950_p8 = scmp.lt.s32.totalorder %s948_s1, %s943_s23 }
  0x4b   : > { %p946_p5 = pnand %p944_p4, %p885_p2 }
  0x4c   : > { %p951_p10 = por %p950_p8, %p949_p0 }
  0x4d   : > { %p947_p7 = pneg %p946_p5 }
  0x4f   : > { %p952_p1 = pnand %p951_p10, %p947_p7 }
  0x51   : > { %955 = shalt.err (!%p952_p1)
}
  0x52   : > { %824 = dma.hbm_to_vmem [thread:$0]  (!%p1206_p13), %s260_s20, 256, %s262_s10, %s1217_s17, %s1428_s26, %s1428_s26, %s1110_s27  }
  0x53   : > { %s280_s13 = scalar_lea.hbm %s1406_s3, %s1201_s7  ;;  %s275_s16 = scalar_lea.vmem [#allocation8], %s1204_s8 }
  0x54   : > { %s281_s15 = sshll.u32 %s280_s13, 4  ;;  %s283_s24 = sshll.u32 %s275_s16, 4  ;;  %s282_s15 = int_to_ptr.hbm [resolvable:$true] %s281_s15  ;;  %s284_s24 = int_to_ptr.vmem [resolvable:$true] %s283_s24 }
  0x55   : > { %s272_s23 = scalar_lea.sflag [#allocation9], %s1198_s6  ;;  %s971_s25 = sshra.s32 %s282_s15, 4  ;;  %s972_s25 = int_to_ptr.hbm [resolvable:$true] %s971_s25 }
  0x56   : > { %s973_s1 = scalar_lea.hbm %s972_s25, 16  ;;  %s978_s10 = scalar_lea.hbm %s1406_s3, 32 }
  0x57   : > { %p974_p4 = scmp.ne.s32.totalorder %s972_s25, %s973_s1  ;;  %p979_p0 = scmp.lt.s32.totalorder %s972_s25, %s1406_s3 }
  0x58   : > { %p980_p8 = scmp.lt.s32.totalorder %s978_s10, %s973_s1 }
  0x59   : > { %p976_p5 = pnand %p974_p4, %p885_p2 }
  0x5a   : > { %p981_p10 = por %p980_p8, %p979_p0 }
  0x5b   : > { %p977_p7 = pneg %p976_p5 }
  0x5d   : > { %p982_p1 = pnand %p981_p10, %p977_p7 }
  0x5f   : > { %985 = shalt.err (!%p982_p1)
}
  0x60   : > { %827 = dma.hbm_to_vmem [thread:$0]  (!%p1206_p13), %s282_s15, 256, %s284_s24, %s272_s23, %s1428_s26, %s1428_s26, %s1110_s27  }
  0x61   : > { %295 = sbr.rel (%p1243_p3) target bundleno = 647 (0x287), region = 36  ;;  %s1306_s6 = sand.u32 (!%p1243_p3), 1, %s1099_s19  }
  0x62   : > { %s1309_s8 = sshll.u32 (!%p1243_p3), %s1306_s6, 4  ;;  %s298_s14 = scalar_lea.sflag (!%p1243_p3), [#allocation3], %s1306_s6 }
  0x63   : > { %s301_s0 = scalar_lea.vmem (!%p1243_p3), [#allocation2], %s1309_s8 }
  0x66   : > { %1074 = dma.done.wait (%p1182_p6), %s298_s14, 256  }
  0x67   : > { %1076 = vsyncadd (%p1182_p6), %s298_s14, 4294967040  ;;  %s307_s27 = sand.u32 1, %s1164_s22   ;;  %s311_s11 = scalar_lea.vmem [#allocation5], %s1309_s8 }
  0x68   : > { %s308_s9 = scalar_lea.sflag [#allocation6], %s307_s27 }
  0x69   : > { %1078 = dma.done.wait (%p1182_p6), %s308_s9, 512  }
  0x6a   : > { %1080 = vsyncadd (%p1182_p6), %s308_s9, 4294966784  ;;  %s321_s26 = scalar_lea.vmem [#allocation7], %s1309_s8  ;;  %s328_s21 = scalar_lea.sflag [#allocation9], %s1306_s6 }
  0x6b   : > { %s331_s13 = scalar_lea.vmem [#allocation8], %s1309_s8 }
  0x6c   : > { %1082 = dma.done.wait (%p1182_p6), %s328_s21, 256  }
  0x6d   : > { %1084 = vsyncadd (%p1182_p6), %s328_s21, 4294967040  ;;  %vm393_vm0 = vcmask 261120   ;;  %v387_v0 = vld [vmem:[%s311_s11] sm:$0xff]  ;;  %v388_v2 = vld [vmem:[%s311_s11 + $0x8] sm:$0xff]  ;;  %vm452_vm2 = vcmask 64512   ;;  %s378_s28 = scalar_lea.vmem [#allocation11], %s1309_s8 }
  0x6e   : > { %v385_v1 = vld [vmem:[%s301_s0] sm:$0xff]  ;;  %783 = vmatpush.xpose.msk.msra.mxu0 %vm393_vm0, %v387_v0  ;;  %785 = vmatpush.xpose.msk.msra.mxu1 %vm393_vm0, %v388_v2  ;;  %v386_v4 = vld [vmem:[%s301_s0 + $0x8] sm:$0xff]  ;;  %s801_s15 = sshll.u32 %s1164_s22, 4  ;;  %s586_s16 = sshll.u32 %s378_s28, 4  ;;  %s587_s16 = int_to_ptr.vmem [resolvable:$true] %s586_s16 }
  0x6f   : > { %v391_v3 = vmul.f32 0.17677669, %v385_v1  ;;  %v392_v5 = vmul.f32 0.17677669, %v386_v4  ;;  %v446_v6 = vld [vmem:[%s331_s13] sm:$0xff]  ;;  %v447_v7 = vld [vmem:[%s331_s13 + $0x8] sm:$0xff]  ;;  %s585_s25 = scalar_lea.hbm %s1408_s5, %s801_s15 }
  0x70   : > { %vm448_vm1 = vcmp.eq.s32.totalorder %v446_v6, 0  ;;  %vm449_vm3 = vcmp.eq.s32.totalorder %v447_v7, 0  ;;  %v389_v24 = vld [vmem:[%s321_s26] sm:$0xff]  ;;  %v390_v25 = vld [vmem:[%s321_s26 + $0x8] sm:$0xff]  ;;  %s588_s1 = sshll.u32 %s585_s25, 4  ;;  %s557_s12 = scalar_lea.sflag [#allocation12], %s1306_s6  ;;  %s589_s1 = int_to_ptr.hbm [resolvable:$true] %s588_s1 }
  0x71   : > { %784 = vmatmul.msk.f32.vlgmr.msra.gmra.mxu0 %vm393_vm0, %v391_v3  ;;  %786 = vmatmul.msk.f32.vlgmr.msra.gmra.mxu1 %vm393_vm0, %v392_v5  ;;  %s1015_s17 = sshra.s32 %s589_s1, 4  ;;  %s1021_s22 = scalar_lea.hbm %s1408_s5, 32  ;;  %s1016_s17 = int_to_ptr.hbm [resolvable:$true] %s1015_s17 }
  0x72   : > { %519 = vmatpush.msra.mxu2 %v389_v24  ;;  %542 = vmatpush.msra.mxu3 %v390_v25  ;;  %s1017_s10 = scalar_lea.hbm %s1016_s17, 16  ;;  %p1022_p3 = scmp.lt.s32.totalorder %s1016_s17, %s1408_s5 }
  0x73   : > { %p1018_p6 = scmp.ne.s32.totalorder %s1016_s17, %s1017_s10  ;;  %p1023_p4 = scmp.lt.s32.totalorder %s1021_s22, %s1017_s10 }
  0x75   : > { %p1019_p13 = pnand %p1018_p6, %p1189_p11  ;;  %p1024_p5 = por %p1023_p4, %p1022_p3 }
  0x77   : > { %p1020_p2 = pneg %p1019_p13 }
  0x79   : > { %p1025_p7 = pnand %p1024_p5, %p1020_p2 }
  0xee   : > { %v417_v8 = vpop.f32.mrf.mxu0  ;;  %v443_v11 = vpop.f32.mrf.mxu1 }
  0xef   : > { %v450_v9 = vsel %vm448_vm1, -1e+09, %v417_v8  ;;  %v451_v12 = vsel %vm449_vm3, -1e+09, %v443_v11 }
  0xf0   : > { %v453_v10 = vsel %vm452_vm2, %v450_v9, -inf  ;;  %v456_v13 = vsel %vm452_vm2, %v451_v12, -inf }
  0xf1   : > { %454 = vmax.xlane.f32.xlu0 %v453_v10 }
  0xf9   : > { %457 = vmax.xlane.f32.xlu0 %v456_v13 }
 0x164   : > { %v455_v14 = vpop.xlane.xlu0 %454 }
 0x165   : > { %v459_v15 = vsub.f32 %v450_v9, %v455_v14 }
 0x167   : > { %v461_v16 = vmul.f32 1.442695, %v459_v15 }
 0x169   : > { %873 = vpow2.f32 %v461_v16 }
 0x16c   : > { %v458_v17 = vpop.xlane.xlu0 %457 }
 0x16d   : > { %v460_v18 = vsub.f32 %v451_v12, %v458_v17 }
 0x16f   : > { %v874_v19 = vpop.eup %873  ;;  %v463_v20 = vmul.f32 1.442695, %v460_v18 }
 0x170   : > { %v465_v21 = vsel %vm452_vm2, %v874_v19, 0.0 }
 0x171   : > { %875 = vpow2.f32 %v463_v20  ;;  %466 = vadd.xlane.f32.xlu1 %v465_v21 }
 0x177   : > { %v876_v22 = vpop.eup %875 }
 0x178   : > { %v468_v23 = vsel %vm452_vm2, %v876_v22, 0.0 }
 0x179   : > { %469 = vadd.xlane.f32.xlu1 %v468_v23 }
 0x1e4   : > { %v467_v26 = vpop.xlane.xlu1 %466 }
 0x1e5   : > { %877 = vrcp.f32 %v467_v26  ;;  %v482_v31 = vand.u32 2147483648, %v467_v26  ;;  %v480_v33 = vand.u32 2147483647, %v467_v26  ;;  %vm476_vm5 = vweird.f32 %v467_v26 }
 0x1e7   : > { %v483_v36 = vor.u32 1.1754944e-38, %v482_v31  ;;  %vm481_vm7 = vcmp.eq.f32.partialorder %v480_v33, 8.507059e+37 }
 0x1eb   : > { %v878_v27 = vpop.eup %877 }
 0x1ec   : > { %v472_v28 = vmul.f32 %v878_v27, %v467_v26  ;;  %v470_v29 = vpop.xlane.xlu1 %469  ;;  %vm477_vm4 = vweird.f32 %v878_v27 }
 0x1ed   : > { %879 = vrcp.f32 %v470_v29  ;;  %vm478_vm6 = vmor %vm476_vm5, %vm477_vm4  ;;  %v496_v42 = vand.u32 2147483648, %v470_v29  ;;  %v494_v44 = vand.u32 2147483647, %v470_v29  ;;  %vm490_vm9 = vweird.f32 %v470_v29 }
 0x1ee   : > { %v473_v30 = vsub.f32 1.0, %v472_v28 }
 0x1ef   : > { %v497_v46 = vor.u32 1.1754944e-38, %v496_v42  ;;  %vm495_vm11 = vcmp.eq.f32.partialorder %v494_v44, 8.507059e+37 }
 0x1f0   : > { %v474_v32 = vmul.f32 %v878_v27, %v473_v30 }
 0x1f2   : > { %v475_v34 = vadd.f32 %v878_v27, %v474_v32 }
 0x1f3   : > { %v880_v35 = vpop.eup %879 }
 0x1f4   : > { %v486_v37 = vmul.f32 %v880_v35, %v470_v29  ;;  %v479_v38 = vsel %vm478_vm6, %v878_v27, %v475_v34  ;;  %vm491_vm8 = vweird.f32 %v880_v35 }
 0x1f5   : > { %v484_v39 = vsel %vm481_vm7, %v483_v36, %v479_v38  ;;  %vm492_vm10 = vmor %vm490_vm9, %vm491_vm8 }
 0x1f6   : > { %v487_v40 = vsub.f32 1.0, %v486_v37  ;;  %v499_v41 = vmul.f32 %v874_v19, %v484_v39 }
 0x1f8   : > { %v488_v43 = vmul.f32 %v880_v35, %v487_v40  ;;  %787 = vmatmul.msk.f32.vlgmr.msra.gmra.mxu2 %vm452_vm2, %v499_v41  ;;  %549 = vst.msk [vmem:[%s378_s28] sm:$0xff] %vm452_vm2, %v499_v41 }
 0x1fa   : > { %v489_v45 = vadd.f32 %v880_v35, %v488_v43 }
 0x1fc   : > { %v493_v47 = vsel %vm492_vm10, %v880_v35, %v489_v45 }
 0x1fd   : > { %v498_v48 = vsel %vm495_vm11, %v497_v46, %v493_v47 }
 0x1fe   : > { %v500_v49 = vmul.f32 %v876_v22, %v498_v48 }
 0x200   : > { %788 = vmatmul.msk.f32.vlgmr.msra.gmra.mxu3 %vm452_vm2, %v500_v49  ;;  %550 = vst.msk [vmem:[%s378_s28 + $0x8] sm:$0xff] %vm452_vm2, %v500_v49 }
 0x201   : > { %1028 = shalt.err (!%p1025_p7)
}
 0x202   : > { %s1111_s27 = smov 128   ;;  %s1112_s9 = smov 8  }
 0x203   : > { %812 = dma.vmem_to_hbm [thread:$0]  (%p1189_p11), %s587_s16, 256, %s589_s1, %s557_s12, %s1111_s27, %s1111_s27, %s1112_s9  }
 0x204   : > { %s371_s11 = scalar_lea.vmem [#allocation10], %s1309_s8  ;;  %s568_s13 = scalar_lea.hbm %s1407_s4, %s801_s15 }
 0x205   : > { %s569_s28 = sshll.u32 %s371_s11, 4  ;;  %s571_s24 = sshll.u32 %s568_s13, 4  ;;  %s570_s28 = int_to_ptr.vmem [resolvable:$true] %s569_s28  ;;  %s572_s24 = int_to_ptr.hbm [resolvable:$true] %s571_s24 }
 0x206   : > { %s552_s23 = scalar_lea.sflag [#allocation4], %s1306_s6  ;;  %s1043_s25 = sshra.s32 %s572_s24, 4  ;;  %s1044_s25 = int_to_ptr.hbm [resolvable:$true] %s1043_s25 }
 0x207   : > { %s1045_s16 = scalar_lea.hbm %s1044_s25, 16  ;;  %s1049_s12 = scalar_lea.hbm %s1407_s4, 32 }
 0x208   : > { %p1046_p0 = scmp.ne.s32.totalorder %s1044_s25, %s1045_s16  ;;  %p1050_p1 = scmp.lt.s32.totalorder %s1044_s25, %s1407_s4 }
 0x209   : > { %p1051_p6 = scmp.lt.s32.totalorder %s1049_s12, %s1045_s16 }
 0x20a   : > { %p1047_p8 = pnand %p1046_p0, %p1189_p11 }
 0x20b   : > { %p1052_p13 = por %p1051_p6, %p1050_p1 }
 0x20c   : > { %p1048_p10 = pneg %p1047_p8 }
 0x20e   : > { %p1053_p2 = pnand %p1052_p13, %p1048_p10 }
 0x27b   : > { %v521_v50 = vpop.f32.mrf.mxu2 }
 0x27c   : > { %547 = vst.msk [vmem:[%s371_s11] sm:$0xff] %vm393_vm0, %v521_v50 }
 0x283   : > { %v544_v51 = vpop.f32.mrf.mxu3 }
 0x284   : > { %548 = vst.msk [vmem:[%s371_s11 + $0x8] sm:$0xff] %vm393_vm0, %v544_v51 }
 0x285   : > { %1056 = shalt.err (!%p1053_p2)
}
 0x286   : > { %811 = dma.vmem_to_hbm [thread:$0]  (%p1189_p11), %s570_s28, 256, %s572_s24, %s552_s23, %s1111_s27, %s1111_s27, %s1112_s9  }
 0x287 PF: > { %s603_s10 = sand.u32 1, %s1095_s18   ;;  %p829_p3 = pnand %p763_p9, %p1193_p12 }
 0x288   : > { %s604_s20 = scalar_lea.sflag [#allocation4], %s603_s10 }
 0x289   : > { %p830_p4 = pneg %p829_p3 }
 0x28b   : > { %1086 = dma.done.wait (%p830_p4), %s604_s20, 256  }
 0x28c   : > { %1088 = vsyncadd (%p830_p4), %s604_s20, 4294967040  ;;  %s614_s7 = scalar_lea.sflag [#allocation12], %s603_s10 }
 0x28d   : > { %1090 = dma.done.wait (%p830_p4), %s614_s7, 256  }
 0x28e   : > { %1092 = vsyncadd (%p830_p4), %s614_s7, 4294967040  ;;  %s1430_s21 = sld [smem:[#allocation20_spill]]  ;;  %s1433_s18 = smov %s1099_s19 }
 0x28f   : > { %s1431_s29 = sld [smem:[#allocation18_spill]] }
 0x290   : > { %s1432_s20 = sld [smem:[#allocation21_spill]] }
 0x294   : > { %p28_p11 = scmp.ge.s32.totalorder %s1430_s21, 4  }
 0x295   : > { %s1434_s19 = smov %s1431_s29 }
 0x296   :  { %30 = sbr.rel (!%p28_p11) target bundleno = 14 (0xe), region = 135 }
 0x29b   :  { %620 = vsyncpa [#allocation3], 1 }
 0x29c   :  { %622 = vsyncpa [#allocation3 + $0x1], 1 }
 0x29d   :  { %623 = vsyncpa [#allocation6], 1 }
 0x29e   :  { %625 = vsyncpa [#allocation6 + $0x1], 1 }
 0x29f   :  { %626 = vsyncpa [#allocation9], 1 }
 0x2a0   :  { %628 = vsyncpa [#allocation9 + $0x1], 1 }
 0x2a1   :  { %629 = vsyncpa [#allocation4], 1 }
 0x2a2   :  { %631 = vsyncpa [#allocation4 + $0x1], 1 }
 0x2a3   :  { %632 = vsyncpa [#allocation12], 1 }
 0x2a4   :  { %634 = vsyncpa [#allocation12 + $0x1], 1 }

</bundles_post_ra>
